<compile_context>
chip_gen: v7x
topology: tpu7x:2x2x1
jax: 0.10.0
libtpu: 0.0.40
codegen_flags: <defaults>
</compile_context>

<pallas_src>
import functools

import jax
import jax.numpy as jnp
from jax.experimental import pallas as pl
from jax.experimental.pallas import tpu as pltpu


def _round_up(x, m):
    return ((x + m - 1) // m) * m


# -----------------------------------------------------------------------------
# Pallas kernel: fc -> relu -> fc -> sigmoid(+eps) -> normalize -> logs
#   outputs:
#     cat_logits = log(mu / (sum(mu) + 1e-8))   (-inf in padded lanes)
#     log_mu     = log(mu)                      (0 in padded lanes, never read)
# -----------------------------------------------------------------------------
def _loc_net_kernel(h_ref, w1_ref, b1_ref, w2_ref, b2_ref,
                    cat_logits_ref, log_mu_ref, *, d_out):
    h = h_ref[...]                                        # (Bp, d_in)   f32
    # fc + relu   (MXU matmul, f32 accumulate)
    feat = jnp.dot(h, w1_ref[...],
                   preferred_element_type=jnp.float32) + b1_ref[...]
    feat = jnp.maximum(feat, 0.0)                         # (Bp, d_hid_pad)

    # fc_lt + sigmoid + eps
    z = jnp.dot(feat, w2_ref[...],
                preferred_element_type=jnp.float32) + b2_ref[...]
    mu = jax.nn.sigmoid(z) + 1e-5                         # (Bp, d_out_pad)

    # Mask padded output lanes before normalization (padded lanes hold
    # sigmoid(0)+1e-5 junk that must not leak into mu_sum).
    lane = jax.lax.broadcasted_iota(jnp.int32, mu.shape, dimension=1)
    valid = lane < d_out
    mu_m = jnp.where(valid, mu, 0.0)

    mu_sum = jnp.sum(mu_m, axis=1, keepdims=True)
    mu_norm = mu_m / (mu_sum + 1e-8)

    neg_inf = jnp.float32(-jnp.inf)
    cat_logits_ref[...] = jnp.where(valid, jnp.log(mu_norm), neg_inf)
    log_mu_ref[...] = jnp.where(valid, jnp.log(mu), 0.0)


# -----------------------------------------------------------------------------
# Wrapper: pad to lane/sublane-dense shapes, single un-gridded pallas_call.
# -----------------------------------------------------------------------------
@functools.partial(jax.jit, static_argnames=("d_out",))
def loc_net_heads(h_t, w1, b1, w2, b2, d_out):
    """Returns (cat_logits (B, d_out), log_mu (B, d_out)) computed on TPU."""
    B, d_in = h_t.shape
    d_hid = w1.shape[1]

    B_pad = _round_up(B, 8)
    d_hid_pad = _round_up(d_hid, 128)
    d_out_pad = _round_up(d_out, 128)

    # Zero padding: padded hidden units are relu(0)=0 and feed zero W2 rows,
    # so they contribute nothing; padded output lanes are masked in-kernel.
    h_p = jnp.zeros((B_pad, d_in), jnp.float32).at[:B, :].set(h_t)
    w1_p = jnp.zeros((d_in, d_hid_pad), jnp.float32).at[:, :d_hid].set(w1)
    b1_p = jnp.zeros((1, d_hid_pad), jnp.float32).at[:, :d_hid].set(b1)
    w2_p = jnp.zeros((d_hid_pad, d_out_pad), jnp.float32).at[:d_hid, :d_out].set(w2)
    b2_p = jnp.zeros((1, d_out_pad), jnp.float32).at[:, :d_out].set(b2)

    out_bytes = 2 * B_pad * d_out_pad * 4
    in_bytes = 4 * (h_p.size + w1_p.size + b1_p.size + w2_p.size + b2_p.size)
    cost = pl.CostEstimate(
        flops=2 * B_pad * (d_in * d_hid_pad + d_hid_pad * d_out_pad),
        transcendentals=3 * B_pad * d_out_pad,     # sigmoid + two logs
        bytes_accessed=in_bytes + out_bytes,
    )

    vmem = pl.BlockSpec(memory_space=pltpu.MemorySpace.VMEM)
    cat_logits, log_mu = pl.pallas_call(
        functools.partial(_loc_net_kernel, d_out=d_out),
        out_shape=(
            jax.ShapeDtypeStruct((B_pad, d_out_pad), jnp.float32),
            jax.ShapeDtypeStruct((B_pad, d_out_pad), jnp.float32),
        ),
        in_specs=[vmem, vmem, vmem, vmem, vmem],
        out_specs=(vmem, vmem),
        cost_estimate=cost,
    )(h_p, w1_p, b1_p, w2_p, b2_p)

    return cat_logits[:B, :d_out], log_mu[:B, :d_out]


# -----------------------------------------------------------------------------
# Full forward pass (matches PyTorch LocationNetwork.forward semantics)
# -----------------------------------------------------------------------------
def location_network_forward(params, h_t, sample_key):
    """Returns (log_pi, l_t) like the PyTorch module.

    log_pi: (B,)   log(mu[index])  (unnormalized mu, matching the Torch code).
    l_t:    (B, 2) one of the four fixed directions scaled by 0.15.
    """
    w1, b1, w2, b2 = params
    d_out = w2.shape[1]

    cat_logits, log_mu = loc_net_heads(h_t, w1, b1, w2, b2, d_out)

    directions = jnp.array([[1, 0], [-1, 0], [0, 1], [0, -1]],
                           dtype=jnp.float32) * 0.15                # (4, 2)
    # torch.multinomial(mu_normalized, 1) == categorical draw from mu_normalized.
    index = jax.random.categorical(sample_key, cat_logits, axis=1)   # (B,)
    l_t = directions[index]                                          # (B, 2)
    log_pi = jnp.take_along_axis(log_mu, index[:, None], axis=1)[:, 0]  # (B,)
    return log_pi, l_t


# -----------------------------------------------------------------------------
# Deterministic parameter init (PyTorch nn.Linear default: U(-1/sqrt(fan_in), .))
# -----------------------------------------------------------------------------
def init_params(key, input_size, output_size):
    hid_size = input_size // 2
    k1, k2, k3, k4 = jax.random.split(key, 4)
    bound1 = 1.0 / jnp.sqrt(input_size)
    bound2 = 1.0 / jnp.sqrt(hid_size)
    w1 = jax.random.uniform(k1, (input_size, hid_size), jnp.float32, -bound1, bound1)
    b1 = jax.random.uniform(k2, (1, hid_size), jnp.float32, -bound1, bound1)
    w2 = jax.random.uniform(k3, (hid_size, output_size), jnp.float32, -bound2, bound2)
    b2 = jax.random.uniform(k4, (1, output_size), jnp.float32, -bound2, bound2)
    return w1, b1, w2, b2


if __name__ == "__main__":
    # Small shapes consistent with the module: B=2, input_size=32 -> hid=16,
    # output_size=4 (direction indexing requires 4 categories).
    B, INPUT_SIZE, OUTPUT_SIZE = 2, 32, 4
    STD = 0.17  # unused in this forward path, kept for parity with __init__

    root = jax.random.PRNGKey(0)
    pkey, hkey, skey = jax.random.split(root, 3)

    params = init_params(pkey, INPUT_SIZE, OUTPUT_SIZE)
    h_t = jax.random.normal(hkey, (B, INPUT_SIZE), dtype=jnp.float32)

    log_pi, l_t = location_network_forward(params, h_t, skey)
    jax.block_until_ready((log_pi, l_t))

    assert log_pi.shape == (B,)
    assert l_t.shape == (B, 2)
    assert jnp.all(jnp.isfinite(log_pi))
    assert jnp.all(jnp.isfinite(l_t))

    print("KERNEL_OK")
</pallas_src>

<mosaic_0001>
module attributes {stable_mosaic.version = 11 : i64} {
  func.func @_loc_net_kernel(%arg0: memref<8x32xf32, #tpu.memory_space<vmem>>, %arg1: memref<32x128xf32, #tpu.memory_space<vmem>>, %arg2: memref<1x128xf32, #tpu.memory_space<vmem>>, %arg3: memref<128x128xf32, #tpu.memory_space<vmem>>, %arg4: memref<1x128xf32, #tpu.memory_space<vmem>>, %arg5: memref<8x128xf32, #tpu.memory_space<vmem>>, %arg6: memref<8x128xf32, #tpu.memory_space<vmem>>) attributes {dimension_semantics = [], scalar_prefetch = 0 : i64, scratch_operands = 0 : i64, tpu.core_type = #tpu.core_type<tc>} {
    %c0 = arith.constant 0 : index
    %c0_0 = arith.constant 0 : index
    %0 = vector.load %arg0[%c0, %c0_0] : memref<8x32xf32, #tpu.memory_space<vmem>>, vector<8x32xf32>
    %c0_1 = arith.constant 0 : index
    %c0_2 = arith.constant 0 : index
    %1 = vector.load %arg1[%c0_1, %c0_2] : memref<32x128xf32, #tpu.memory_space<vmem>>, vector<32x128xf32>
    %cst = arith.constant dense<0.000000e+00> : vector<8x128xf32>
    %2 = tpu.matmul %0, %1, %cst {dimension_numbers = #tpu.dot_dimension_numbers<[1], [0], [0], [1], [0, 0, 1, 1], [], []>} : vector<8x32xf32>, vector<32x128xf32>, vector<8x128xf32> -> vector<8x128xf32>
    %c0_3 = arith.constant 0 : index
    %c0_4 = arith.constant 0 : index
    %3 = vector.load %arg2[%c0_3, %c0_4] : memref<1x128xf32, #tpu.memory_space<vmem>>, vector<1x128xf32>
    %4 = vector.broadcast %3 : vector<1x128xf32> to vector<8x128xf32>
    %5 = arith.addf %2, %4 : vector<8x128xf32>
    %cst_5 = arith.constant 0.000000e+00 : f32
    %6 = vector.broadcast %cst_5 : f32 to vector<8x128xf32>
    %7 = arith.maximumf %5, %6 : vector<8x128xf32>
    %c0_6 = arith.constant 0 : index
    %c0_7 = arith.constant 0 : index
    %8 = vector.load %arg3[%c0_6, %c0_7] : memref<128x128xf32, #tpu.memory_space<vmem>>, vector<128x128xf32>
    %cst_8 = arith.constant dense<0.000000e+00> : vector<8x128xf32>
    %9 = tpu.matmul %7, %8, %cst_8 {dimension_numbers = #tpu.dot_dimension_numbers<[1], [0], [0], [1], [0, 0, 1, 1], [], []>} : vector<8x128xf32>, vector<128x128xf32>, vector<8x128xf32> -> vector<8x128xf32>
    %c0_9 = arith.constant 0 : index
    %c0_10 = arith.constant 0 : index
    %10 = vector.load %arg4[%c0_9, %c0_10] : memref<1x128xf32, #tpu.memory_space<vmem>>, vector<1x128xf32>
    %11 = vector.broadcast %10 : vector<1x128xf32> to vector<8x128xf32>
    %12 = arith.addf %9, %11 : vector<8x128xf32>
    %13 = arith.negf %12 : vector<8x128xf32>
    %14 = math.exp %13 : vector<8x128xf32>
    %cst_11 = arith.constant 1.000000e+00 : f32
    %15 = vector.broadcast %cst_11 : f32 to vector<8x128xf32>
    %16 = arith.addf %15, %14 : vector<8x128xf32>
    %17 = arith.divf %15, %16 : vector<8x128xf32>
    %cst_12 = arith.constant 9.99999974E-6 : f32
    %18 = vector.broadcast %cst_12 : f32 to vector<8x128xf32>
    %19 = arith.addf %17, %18 : vector<8x128xf32>
    %20 = tpu.iota {dimensions = array<i32: 1>} : vector<8x128xi32>
    %c4_i32 = arith.constant 4 : i32
    %21 = vector.broadcast %c4_i32 : i32 to vector<8x128xi32>
    %22 = arith.cmpi slt, %20, %21 : vector<8x128xi32>
    %cst_13 = arith.constant 0.000000e+00 : f32
    %23 = vector.broadcast %cst_13 : f32 to vector<8x128xf32>
    %24 = arith.select %22, %19, %23 : vector<8x128xi1>, vector<8x128xf32>
    %cst_14 = arith.constant dense<0.000000e+00> : vector<8xf32>
    %25 = vector.multi_reduction <add>, %24, %cst_14 [1] : vector<8x128xf32> to vector<8xf32>
    %26 = vector.shape_cast %25 : vector<8xf32> to vector<8x1xf32>
    %cst_15 = arith.constant 9.99999993E-9 : f32
    %27 = vector.broadcast %cst_15 : f32 to vector<8x1xf32>
    %28 = arith.addf %26, %27 : vector<8x1xf32>
    %29 = vector.broadcast %28 : vector<8x1xf32> to vector<8x128xf32>
    %30 = arith.divf %24, %29 : vector<8x128xf32>
    %31 = math.log %30 : vector<8x128xf32>
    %cst_16 = arith.constant 0xFF800000 : f32
    %32 = vector.broadcast %cst_16 : f32 to vector<8x128xf32>
    %33 = arith.select %22, %31, %32 : vector<8x128xi1>, vector<8x128xf32>
    %c0_17 = arith.constant 0 : index
    %c0_18 = arith.constant 0 : index
    %34 = vector.load %arg5[%c0_17, %c0_18] : memref<8x128xf32, #tpu.memory_space<vmem>>, vector<8x128xf32>
    tpu.vector_store %arg5[%c0_17, %c0_18], %33 {strides = array<i32>} : memref<8x128xf32, #tpu.memory_space<vmem>>, vector<8x128xf32>,
    %35 = math.log %19 : vector<8x128xf32>
    %cst_19 = arith.constant 0.000000e+00 : f32
    %36 = vector.broadcast %cst_19 : f32 to vector<8x128xf32>
    %37 = arith.select %22, %35, %36 : vector<8x128xi1>, vector<8x128xf32>
    %c0_20 = arith.constant 0 : index
    %c0_21 = arith.constant 0 : index
    %38 = vector.load %arg6[%c0_20, %c0_21] : memref<8x128xf32, #tpu.memory_space<vmem>>, vector<8x128xf32>
    tpu.vector_store %arg6[%c0_20, %c0_21], %37 {strides = array<i32>} : memref<8x128xf32, #tpu.memory_space<vmem>>, vector<8x128xf32>,
    return
  }
}

</mosaic_0001>

<bundles_post_ra>
// kernel: loc_net_heads.1
= control target key start
LH: loop header
LB: loop body
LE: loop exit
PB: predicated region body
PF: predicated region fallthrough
CT: control target
= control target key end

     0   :  { %v349_v0 = vmov 0.0|0.0   ;;  %vm350_vm0 = vmmov 0   ;;  %v351_v4 = vmov 0.0   ;;  %vm34_vm1 = vcmask 261120   ;;  %s465_s1 = inlined_call_operand.vmem [shape: f32[32,128], index: 1, kind: input, shape index: {}]   ;;  %s466_s3 = inlined_call_operand.vmem [shape: f32[128,128], index: 3, kind: input, shape index: {}]   ;;  %s467_s0 = inlined_call_operand.vmem [shape: f32[8,32], index: 0, kind: input, shape index: {}]   ;;  %s468_s2 = inlined_call_operand.vmem [shape: f32[1,128], index: 2, kind: input, shape index: {}]   ;;  %s469_s4 = inlined_call_operand.vmem [shape: f32[1,128], index: 4, kind: input, shape index: {}]   ;;  %s470_s6 = inlined_call_operand.vmem [shape: f32[8,128], index: 6, kind: output, shape index: {1}]   ;;  %s471_s5 = inlined_call_operand.vmem [shape: f32[8,128], index: 5, kind: output, shape index: {0}]  }
   0x1   :  { %306 = vmatprep.subr.bf16.mxu0 %v349_v0  ;;  %v23_v1 = vld [vmem:[%s465_s1] sm:$0xff]  ;;  %v24_v2 = vld [vmem:[%s465_s1 + $0x8] sm:$0xff]  ;;  %v25_v3 = vld [vmem:[%s465_s1 + $0x10] sm:$0xff]  ;;  %268 = vmatprep.mubr.msk.f32.mxu0 %vm350_vm0, %v351_v4  ;;  %v209_v45 = vlaneseq }
   0x2   :  { %v307_v5 = vpack.c.bf16 %v24_v2, %v23_v1  ;;  %v26_v6 = vld [vmem:[%s465_s1 + $0x18] sm:$0xff]  ;;  %312 = vmatprep.subr.bf16.mxu1 %v349_v0  ;;  %v109_v7 = vld [vmem:[%s466_s3] sm:$0xff]  ;;  %303 = vmatprep.mubr.msk.f32.mxu1 %vm350_vm0, %v351_v4  ;;  %v110_v8 = vld [vmem:[%s466_s3 + $0x8] sm:$0xff] }
   0x3   :  { %v111_v9 = vld [vmem:[%s466_s3 + $0x10] sm:$0xff]  ;;  %v112_v10 = vld [vmem:[%s466_s3 + $0x18] sm:$0xff]  ;;  %v310_v11 = vpack.c.bf16 %v26_v6, %v25_v3  ;;  %v313_v12 = vpack.c.bf16 %v110_v8, %v109_v7  ;;  %v113_v14 = vld [vmem:[%s466_s3 + $0x20] sm:$0xff]  ;;  %v210_v46 = vand.u32 127, %v209_v45 }
   0x4   :  { %308 = vmatpush3.bf16.msra.mxu0 %v307_v5  ;;  %v316_v13 = vpack.c.bf16 %v112_v10, %v111_v9  ;;  %v114_v15 = vld [vmem:[%s466_s3 + $0x28] sm:$0xff]  ;;  %v22_v16 = vld [vmem:[%s467_s0] sm:$0xff]  ;;  %v115_v18 = vld [vmem:[%s466_s3 + $0x30] sm:$0xff] }
   0x5   :  { %309 = vmatprep.subr.bf16.mxu0 %v349_v0  ;;  %314 = vmatpush3.bf16.msra.mxu1 %v313_v12  ;;  %v319_v17 = vpack.c.bf16 %v114_v15, %v113_v14  ;;  %v116_v19 = vld [vmem:[%s466_s3 + $0x38] sm:$0xff]  ;;  %v117_v21 = vld [vmem:[%s466_s3 + $0x40] sm:$0xff]  ;;  %v118_v22 = vld [vmem:[%s466_s3 + $0x48] sm:$0xff]  ;;  %vm211_vm2 = vcmp.lt.s32.totalorder %v210_v46, 4 }
   0x6   :  { %315 = vmatprep.subr.bf16.mxu1 %v349_v0  ;;  %v322_v20 = vpack.c.bf16 %v116_v19, %v115_v18  ;;  %v325_v23 = vpack.c.bf16 %v118_v22, %v117_v21  ;;  %v119_v24 = vld [vmem:[%s466_s3 + $0x50] sm:$0xff]  ;;  %v120_v25 = vld [vmem:[%s466_s3 + $0x58] sm:$0xff]  ;;  %v121_v27 = vld [vmem:[%s466_s3 + $0x60] sm:$0xff] }
   0x7   :  { %v328_v26 = vpack.c.bf16 %v120_v25, %v119_v24  ;;  %v122_v28 = vld [vmem:[%s466_s3 + $0x68] sm:$0xff]  ;;  %v123_v30 = vld [vmem:[%s466_s3 + $0x70] sm:$0xff]  ;;  %v124_v31 = vld [vmem:[%s466_s3 + $0x78] sm:$0xff] }
   0x8   :  { %311 = vmatpush3.bf16.msra.mxu0 %v310_v11  ;;  %v331_v29 = vpack.c.bf16 %v122_v28, %v121_v27  ;;  %v334_v32 = vpack.c.bf16 %v124_v31, %v123_v30  ;;  %v234_v33 = vld [vmem:[%s468_s2] ss:$0 sm:$0xff] }
   0x9   :  { %317 = vmatpush3.bf16.msra.mxu1 %v316_v13  ;;  %v236_v38 = vld [vmem:[%s469_s4] ss:$0 sm:$0xff] }
   0xa   :  { %318 = vmatprep.subr.bf16.mxu1 %v349_v0 }
   0xb   :  { %269 = vmatmul.mubr.msk.f32.vlgmr.msra.gmra.mrb[0].mxu0 %vm34_vm1, %v22_v16 }
   0xd   :  { %320 = vmatpush3.bf16.msra.mxu1 %v319_v17 }
   0xe   :  { %321 = vmatprep.subr.bf16.mxu1 %v349_v0 }
  0x11   :  { %323 = vmatpush3.bf16.msra.mxu1 %v322_v20 }
  0x12   :  { %324 = vmatprep.subr.bf16.mxu1 %v349_v0 }
  0x15   :  { %326 = vmatpush3.bf16.msra.mxu1 %v325_v23 }
  0x16   :  { %327 = vmatprep.subr.bf16.mxu1 %v349_v0 }
  0x19   :  { %329 = vmatpush3.bf16.msra.mxu1 %v328_v26 }
  0x1a   :  { %330 = vmatprep.subr.bf16.mxu1 %v349_v0 }
  0x1d   :  { %332 = vmatpush3.bf16.msra.mxu1 %v331_v29 }
  0x1e   :  { %333 = vmatprep.subr.bf16.mxu1 %v349_v0 }
  0x21   :  { %335 = vmatpush3.bf16.msra.mxu1 %v334_v32 }
  0xde   :  { %v104_v34 = vpop.f32.mrb[0].mxu0 }
  0xdf   :  { %v105_v35 = vadd.f32 %v234_v33, %v104_v34  ;;  %v270_v36 = vpop.f32.mrb[1].mxu0 }
  0xe1   :  { %v108_v37 = vmax.f32 %v105_v35, 0.0 }
  0xe3   :  { %304 = vmatmul.mubr.f32.vlgmr.msra.gmra.mrb[0].mxu1 %v108_v37 }
 0x1b6   :  { %v198_v39 = vpop.f32.mrb[0].mxu1 }
 0x1b7   :  { %v199_v40 = vadd.f32 %v236_v38, %v198_v39  ;;  %v305_v41 = vpop.f32.mrb[1].mxu1 }
 0x1b9   :  { %v237_v42 = vmul.f32 -1.442695, %v199_v40 }
 0x1bb   :  { %339 = vpow2.f32 %v237_v42 }
 0x1c5   :  { %v340_v43 = vpop.eup %339 }
 0x1c6   :  { %v205_v44 = vadd.f32 1.0, %v340_v43 }
 0x1c8   :  { %341 = vrcp.f32 %v205_v44 }
 0x1d2   :  { %v342_v47 = vpop.eup %341 }
 0x1d3   :  { %v208_v48 = vadd.f32 1e-05, %v342_v47 }
 0x1d5   :  { %v212_v49 = vsel %vm211_vm2, %v208_v48, 0.0  ;;  %343 = vlog2.f32 %v208_v48 }
 0x1d6   :  { %213 = vadd.xlane.f32.xlu0 %v212_v49 }
 0x1df   :  { %v344_v50 = vpop.eup %343 }
 0x1e0   :  { %v223_v51 = vmul.f32 0.6931472, %v344_v50 }
 0x1e2   :  { %v224_v52 = vsel %vm211_vm2, %v223_v51, 0.0 }
 0x1e3   :  { %225 = vst [vmem:[%s470_s6] sm:$0xff] %v224_v52 }
 0x263   :  { %v214_v53 = vpop.xlane.xlu0 %213 }
 0x264   :  { %v215_v54 = vadd.f32 1e-08, %v214_v53 }
 0x266   :  { %345 = vrcp.f32 %v215_v54 }
 0x270   :  { %v346_v55 = vpop.eup %345 }
 0x271   :  { %v217_v56 = vmul.f32 %v346_v55, %v212_v49 }
 0x273   :  { %347 = vlog2.f32 %v217_v56 }
 0x27d   :  { %v348_v57 = vpop.eup %347 }
 0x27e   :  { %v219_v58 = vmul.f32 0.6931472, %v348_v57 }
 0x280   :  { %v220_v59 = vsel %vm211_vm2, %v219_v58, -inf }
 0x281   :  { %221 = vst [vmem:[%s471_s5] sm:$0xff] %v220_v59 }

</bundles_post_ra>
